<compile_context>
chip_gen: v7x
topology: tpu7x:2x2x1
jax: 0.10.0
libtpu: 0.0.40
codegen_flags: <defaults>
</compile_context>

<pallas_src>
import functools

import jax
import jax.numpy as jnp
import numpy as np
from jax.experimental import pallas as pl
from jax.experimental.pallas import tpu as pltpu

LN_EPS = 1e-5  # torch.nn.LayerNorm default


def _align_block_kernel(x_ref, v_ref, w_ref, b_ref, o_ref, *, ch, hidden, seq):
    bt = x_ref.shape[0]

    x = x_ref[...].reshape(bt, seq, hidden)            # (bt, S, H) f32, residual 1
    vemb = v_ref[...]                                   # (bt, CH)  bf16

    # weight slab rows (bf16): [ wv@wo (CH) | fc1_w (H) | fc2_w (H) ], all (*, H)
    wvo = w_ref[0:ch, :]
    w1 = w_ref[ch:ch + hidden, :]
    w2 = w_ref[ch + hidden:ch + 2 * hidden, :]

    # bias slab rows (f32): [ bv@wo + bo, ln2_g, ln2_b, fc1_b, fc2_b ]
    bvo = b_ref[0:1, :]
    g2 = b_ref[1:2, :]
    be2 = b_ref[2:3, :]
    b1 = b_ref[3:4, :]
    b2 = b_ref[4:5, :]

    # ---- cross attention, kv length == 1: softmax over a single key is identically 1,
    # so every query row attends to the single (fused) V/out projection of v_emb.
    # TODO(synk): restore q/k/scores + attn_norm if padding_mask is ever implemented.
    attn_rows = jnp.dot(vemb, wvo, preferred_element_type=jnp.float32) + bvo    # (bt, H)
    h = x + attn_rows[:, None, :]                                               # (bt, S, H)

    # ---- mlp_norm: LayerNorm over H (f32) ----
    mean = jnp.mean(h, axis=-1, keepdims=True)
    var = jnp.mean((h - mean) ** 2, axis=-1, keepdims=True)
    hn = (h - mean) * jax.lax.rsqrt(var + LN_EPS) * g2 + be2                    # (bt, S, H)

    # ---- MLP: fc2(relu(fc1(dropout(x)))), dropout == identity in eval mode ----
    hf = hn.reshape(bt * seq, hidden).astype(jnp.bfloat16)
    m = jnp.dot(hf, w1, preferred_element_type=jnp.float32) + b1
    m = jnp.maximum(m, 0.0)
    m = jnp.dot(m.astype(jnp.bfloat16), w2, preferred_element_type=jnp.float32) + b2

    out = m.reshape(bt, seq, hidden) + h                                        # residual 2
    o_ref[...] = out.reshape(bt, seq * hidden)                                  # lane-dense store


def pack_align_params(params, compute_dtype=jnp.bfloat16):
    """Build the fused / packed weight & bias slabs ONCE (hoisted out of the call path).

    Folds linear_out into linear_v (valid because the kv sequence length is 1):
        (v @ wv + bv) @ wo + bo  ==  v @ (wv @ wo) + (bv @ wo + bo)
    """
    wv = params["wv"].astype(jnp.float32)
    wo = params["wo"].astype(jnp.float32)
    wv_fused = wv @ wo                                           # (CH, H), fused in f32
    bv_fused = params["bv"].astype(jnp.float32) @ wo + params["bo"].astype(jnp.float32)

    w_slab = jnp.concatenate(
        [wv_fused,
         params["fc1_w"].astype(jnp.float32),
         params["fc2_w"].astype(jnp.float32)],
        axis=0).astype(compute_dtype)                            # (CH + 2H, H) bf16

    def row(a):
        return a.reshape(1, -1).astype(jnp.float32)

    b_slab = jnp.concatenate(
        [row(bv_fused),
         row(params["ln2_g"]), row(params["ln2_b"]),
         row(params["fc1_b"]), row(params["fc2_b"])],
        axis=0)                                                  # (5, H) f32
    return w_slab, b_slab


def _choose_batch_tile(B, S, H, CH, *, target_rows=512, vmem_budget=40 * 1024 * 1024):
    """Pick batch elements per grid step.

    Single step when B*S <= 512 rows (extra steps are pure per-step overhead on 1-TC
    chips and v7x's 2 TCs only pay off at >=~256 rows/core); otherwise ~target_rows
    rows/step with bt a multiple of 8 (block layout rule) - B gets padded to bt*grid.
    """
    def vmem_bytes(b):
        act = 2 * b * S * H * 4 * 2          # x + out blocks, f32, double-buffered
        act += 2 * b * CH * 2                # v_emb block, bf16, double-buffered
        slabs = (CH + 2 * H) * H * 2 + 8 * 128 * 4
        return act + slabs

    if B * S <= 512:
        bt = B
    else:
        bt = max(8, (max(1, target_rows // S) // 8) * 8)
        bt = min(bt, B)
        while bt > 8 and vmem_bytes(bt) > vmem_budget:
            bt = max(8, ((bt // 2) // 8) * 8)
    return bt, vmem_bytes(bt)


def aig_align_block(input_nodes, input_verilogs, w_slab, b_slab, padding_mask=None):
    """Forward of AIGAlignBlock (eval mode). `w_slab`/`b_slab` from pack_align_params."""
    assert padding_mask is None, "Pallas kernel implements the padding_mask=None path only"
    B, S, H = input_nodes.shape
    CH = input_verilogs.shape[-1]
    assert w_slab.shape == (CH + 2 * H, H) and b_slab.shape == (5, H)

    x = input_nodes.astype(jnp.float32).reshape(B, S * H)        # lane-dense activations
    v = input_verilogs.astype(w_slab.dtype)                      # (B, CH) bf16

    bt, vmem_est = _choose_batch_tile(B, S, H, CH)
    grid_b = pl.cdiv(B, bt)
    Bp = grid_b * bt
    if Bp != B:                                                  # pad instead of divisor search
        x = jnp.pad(x, ((0, Bp - B), (0, 0)))
        v = jnp.pad(v, ((0, Bp - B), (0, 0)))

    kernel = functools.partial(_align_block_kernel, ch=CH, hidden=H, seq=S)

    cp_kwargs = dict(dimension_semantics=("parallel",))
    if vmem_est > 24 * 1024 * 1024:                              # nearing 32 MiB scoped default
        cp_kwargs["vmem_limit_bytes"] = 48 * 1024 * 1024         # still safe on v7x (64 MiB)

    out = pl.pallas_call(
        kernel,
        out_shape=jax.ShapeDtypeStruct((Bp, S * H), jnp.float32),
        grid=(grid_b,),
        in_specs=[
            pl.BlockSpec((bt, S * H), lambda i: (i, 0)),                       # activations
            pl.BlockSpec((bt, CH), lambda i: (i, 0)),                          # verilog emb
            pl.BlockSpec(w_slab.shape, lambda i: (0, 0),
                         pipeline_mode=pl.Buffered(1)),                        # packed weights
            pl.BlockSpec(b_slab.shape, lambda i: (0, 0),
                         pipeline_mode=pl.Buffered(1)),                        # packed biases/LN
        ],
        out_specs=pl.BlockSpec((bt, S * H), lambda i: (i, 0)),
        compiler_params=pltpu.CompilerParams(**cp_kwargs),
    )(x, v, w_slab, b_slab)

    return out[:B].reshape(B, S, H)


def reference(input_nodes, input_verilogs, params, num_heads):
    """Pure-JAX replica of the PyTorch forward (padding_mask=None, eval mode)."""
    import math
    B, S, H = input_nodes.shape
    head_dim = H // num_heads

    def ln(z, g, b):
        mu = z.mean(-1, keepdims=True)
        var = ((z - mu) ** 2).mean(-1, keepdims=True)
        return (z - mu) / jnp.sqrt(var + LN_EPS) * g + b

    res = input_nodes
    xn = ln(input_nodes, params["ln1_g"], params["ln1_b"])
    vrow = input_verilogs[:, None, :]                                   # (B, 1, CH)
    q = xn @ params["wq"] + params["bq"]
    k = vrow @ params["wk"] + params["bk"]
    v = vrow @ params["wv"] + params["bv"]
    q = q.reshape(B, S, num_heads, head_dim).transpose(0, 2, 1, 3)
    k = k.reshape(B, 1, num_heads, head_dim).transpose(0, 2, 1, 3)
    v = v.reshape(B, 1, num_heads, head_dim).transpose(0, 2, 1, 3)
    scores = q @ k.transpose(0, 1, 3, 2) / math.sqrt(head_dim)
    w = jax.nn.softmax(scores, axis=-1)
    ao = (w @ v).transpose(0, 2, 1, 3).reshape(B, S, H)
    ao = ao @ params["wo"] + params["bo"]
    h = ao + res
    hn = ln(h, params["ln2_g"], params["ln2_b"])
    m = jnp.maximum(hn @ params["fc1_w"] + params["fc1_b"], 0.0)
    m = m @ params["fc2_w"] + params["fc2_b"]
    return m + h


if __name__ == "__main__":
    B, S, H, CH, NH = 2, 8, 32, 48, 4   # hidden_size=32, cross_hidden_size=48, cross_num_heads=4

    key = jax.random.PRNGKey(0)
    keys = jax.random.split(key, 20)

    def init(k, shape, scale=0.05):
        return jax.random.normal(k, shape, jnp.float32) * scale

    x = jax.random.normal(keys[0], (B, S, H), jnp.float32)
    v_emb = jax.random.normal(keys[1], (B, CH), jnp.float32)

    params = dict(
        wq=init(keys[2], (H, H)),   bq=init(keys[3], (H,)),
        wk=init(keys[4], (CH, H)),  bk=init(keys[5], (H,)),
        wv=init(keys[6], (CH, H)),  bv=init(keys[7], (H,)),
        wo=init(keys[8], (H, H)),   bo=init(keys[9], (H,)),
        ln1_g=jnp.ones((H,), jnp.float32) + init(keys[10], (H,)),
        ln1_b=init(keys[11], (H,)),
        ln2_g=jnp.ones((H,), jnp.float32) + init(keys[12], (H,)),
        ln2_b=init(keys[13], (H,)),
        fc1_w=init(keys[14], (H, H)), fc1_b=init(keys[15], (H,)),
        fc2_w=init(keys[16], (H, H)), fc2_b=init(keys[17], (H,)),
    )

    # Slabs are packed once (outside the per-forward path).
    w_slab, b_slab = pack_align_params(params)

    out = aig_align_block(x, v_emb, w_slab, b_slab)
    out = jax.block_until_ready(out)

    ref = reference(x, v_emb, params, NH)
    assert out.shape == (B, S, H)
    # bf16 matmul operands (f32 accumulation) -> slightly looser tolerance than pure f32.
    np.testing.assert_allclose(np.asarray(out), np.asarray(ref), rtol=1e-2, atol=1e-2)

    print("KERNEL_OK")
</pallas_src>

<mosaic_0001>
module attributes {stable_mosaic.version = 11 : i64} {
  func.func @_align_block_kernel(%arg0: i32, %arg1: memref<2x256xf32, #tpu.memory_space<vmem>>, %arg2: memref<2x48xbf16, #tpu.memory_space<vmem>>, %arg3: memref<112x32xbf16, #tpu.memory_space<vmem>>, %arg4: memref<5x32xf32, #tpu.memory_space<vmem>>, %arg5: memref<2x256xf32, #tpu.memory_space<vmem>>) attributes {dimension_semantics = [#tpu.dimension_semantics<parallel>], iteration_bounds = array<i64: 1>, scalar_prefetch = 0 : i64, scratch_operands = 0 : i64, tpu.core_type = #tpu.core_type<tc>, window_params = [{transform_indices = @transform_0, window_bounds = array<i64: 2, 256>}, {transform_indices = @transform_1, window_bounds = array<i64: 2, 48>}, {pipeline_mode = #tpu.pipeline_mode<synchronous>, transform_indices = @transform_2, window_bounds = array<i64: 112, 32>}, {pipeline_mode = #tpu.pipeline_mode<synchronous>, transform_indices = @transform_3, window_bounds = array<i64: 5, 32>}, {transform_indices = @transform_4, window_bounds = array<i64: 2, 256>}]} {
    %c0 = arith.constant 0 : index
    %c0_0 = arith.constant 0 : index
    %0 = vector.load %arg1[%c0, %c0_0] : memref<2x256xf32, #tpu.memory_space<vmem>>, vector<2x256xf32>
    %1 = vector.shape_cast %0 : vector<2x256xf32> to vector<2x8x32xf32>
    %c0_1 = arith.constant 0 : index
    %c0_2 = arith.constant 0 : index
    %2 = vector.load %arg2[%c0_1, %c0_2] : memref<2x48xbf16, #tpu.memory_space<vmem>>, vector<2x48xbf16>
    %c0_3 = arith.constant 0 : index
    %c0_4 = arith.constant 0 : index
    %3 = vector.load %arg3[%c0_3, %c0_4] : memref<112x32xbf16, #tpu.memory_space<vmem>>, vector<48x32xbf16>
    %c48 = arith.constant 48 : index
    %c0_5 = arith.constant 0 : index
    %4 = vector.load %arg3[%c48, %c0_5] : memref<112x32xbf16, #tpu.memory_space<vmem>>, vector<32x32xbf16>
    %c80 = arith.constant 80 : index
    %c0_6 = arith.constant 0 : index
    %5 = vector.load %arg3[%c80, %c0_6] : memref<112x32xbf16, #tpu.memory_space<vmem>>, vector<32x32xbf16>
    %c0_7 = arith.constant 0 : index
    %c0_8 = arith.constant 0 : index
    %6 = vector.load %arg4[%c0_7, %c0_8] : memref<5x32xf32, #tpu.memory_space<vmem>>, vector<1x32xf32>
    %c1 = arith.constant 1 : index
    %c0_9 = arith.constant 0 : index
    %7 = vector.load %arg4[%c1, %c0_9] : memref<5x32xf32, #tpu.memory_space<vmem>>, vector<1x32xf32>
    %c2 = arith.constant 2 : index
    %c0_10 = arith.constant 0 : index
    %8 = vector.load %arg4[%c2, %c0_10] : memref<5x32xf32, #tpu.memory_space<vmem>>, vector<1x32xf32>
    %c3 = arith.constant 3 : index
    %c0_11 = arith.constant 0 : index
    %9 = vector.load %arg4[%c3, %c0_11] : memref<5x32xf32, #tpu.memory_space<vmem>>, vector<1x32xf32>
    %c4 = arith.constant 4 : index
    %c0_12 = arith.constant 0 : index
    %10 = vector.load %arg4[%c4, %c0_12] : memref<5x32xf32, #tpu.memory_space<vmem>>, vector<1x32xf32>
    %cst = arith.constant dense<0.000000e+00> : vector<2x32xf32>
    %11 = tpu.matmul %2, %3, %cst {dimension_numbers = #tpu.dot_dimension_numbers<[1], [0], [0], [1], [0, 0, 1, 1], [], []>} : vector<2x48xbf16>, vector<48x32xbf16>, vector<2x32xf32> -> vector<2x32xf32>
    %12 = vector.broadcast %6 : vector<1x32xf32> to vector<2x32xf32>
    %13 = arith.addf %11, %12 : vector<2x32xf32>
    %14 = vector.shape_cast %13 : vector<2x32xf32> to vector<2x1x32xf32>
    %15 = vector.broadcast %14 : vector<2x1x32xf32> to vector<2x8x32xf32>
    %16 = arith.addf %1, %15 : vector<2x8x32xf32>
    %cst_13 = arith.constant dense<0.000000e+00> : vector<2x8xf32>
    %17 = vector.multi_reduction <add>, %16, %cst_13 [2] : vector<2x8x32xf32> to vector<2x8xf32>
    %18 = vector.shape_cast %17 : vector<2x8xf32> to vector<2x8x1xf32>
    %cst_14 = arith.constant 3.200000e+01 : f32
    %19 = vector.broadcast %cst_14 : f32 to vector<2x8x1xf32>
    %20 = arith.divf %18, %19 : vector<2x8x1xf32>
    %21 = vector.broadcast %20 : vector<2x8x1xf32> to vector<2x8x32xf32>
    %22 = arith.subf %16, %21 : vector<2x8x32xf32>
    %23 = arith.mulf %22, %22 : vector<2x8x32xf32>
    %cst_15 = arith.constant dense<0.000000e+00> : vector<2x8xf32>
    %24 = vector.multi_reduction <add>, %23, %cst_15 [2] : vector<2x8x32xf32> to vector<2x8xf32>
    %25 = vector.shape_cast %24 : vector<2x8xf32> to vector<2x8x1xf32>
    %cst_16 = arith.constant 3.200000e+01 : f32
    %26 = vector.broadcast %cst_16 : f32 to vector<2x8x1xf32>
    %27 = arith.divf %25, %26 : vector<2x8x1xf32>
    %28 = vector.broadcast %20 : vector<2x8x1xf32> to vector<2x8x32xf32>
    %29 = arith.subf %16, %28 : vector<2x8x32xf32>
    %cst_17 = arith.constant 9.99999974E-6 : f32
    %30 = vector.broadcast %cst_17 : f32 to vector<2x8x1xf32>
    %31 = arith.addf %27, %30 : vector<2x8x1xf32>
    %32 = math.rsqrt %31 : vector<2x8x1xf32>
    %33 = vector.broadcast %32 : vector<2x8x1xf32> to vector<2x8x32xf32>
    %34 = arith.mulf %29, %33 : vector<2x8x32xf32>
    %35 = vector.shape_cast %7 : vector<1x32xf32> to vector<1x1x32xf32>
    %36 = vector.broadcast %35 : vector<1x1x32xf32> to vector<2x8x32xf32>
    %37 = arith.mulf %34, %36 : vector<2x8x32xf32>
    %38 = vector.shape_cast %8 : vector<1x32xf32> to vector<1x1x32xf32>
    %39 = vector.broadcast %38 : vector<1x1x32xf32> to vector<2x8x32xf32>
    %40 = arith.addf %37, %39 : vector<2x8x32xf32>
    %41 = vector.shape_cast %40 : vector<2x8x32xf32> to vector<16x32xf32>
    %42 = arith.truncf %41 : vector<16x32xf32> to vector<16x32xbf16>
    %cst_18 = arith.constant dense<0.000000e+00> : vector<16x32xf32>
    %43 = tpu.matmul %42, %4, %cst_18 {dimension_numbers = #tpu.dot_dimension_numbers<[1], [0], [0], [1], [0, 0, 1, 1], [], []>} : vector<16x32xbf16>, vector<32x32xbf16>, vector<16x32xf32> -> vector<16x32xf32>
    %44 = vector.broadcast %9 : vector<1x32xf32> to vector<16x32xf32>
    %45 = arith.addf %43, %44 : vector<16x32xf32>
    %cst_19 = arith.constant 0.000000e+00 : f32
    %46 = vector.broadcast %cst_19 : f32 to vector<16x32xf32>
    %47 = arith.maximumf %45, %46 : vector<16x32xf32>
    %48 = arith.truncf %47 : vector<16x32xf32> to vector<16x32xbf16>
    %cst_20 = arith.constant dense<0.000000e+00> : vector<16x32xf32>
    %49 = tpu.matmul %48, %5, %cst_20 {dimension_numbers = #tpu.dot_dimension_numbers<[1], [0], [0], [1], [0, 0, 1, 1], [], []>} : vector<16x32xbf16>, vector<32x32xbf16>, vector<16x32xf32> -> vector<16x32xf32>
    %50 = vector.broadcast %10 : vector<1x32xf32> to vector<16x32xf32>
    %51 = arith.addf %49, %50 : vector<16x32xf32>
    %52 = vector.shape_cast %51 : vector<16x32xf32> to vector<2x8x32xf32>
    %53 = arith.addf %52, %16 : vector<2x8x32xf32>
    %54 = vector.shape_cast %53 : vector<2x8x32xf32> to vector<2x256xf32>
    %c0_21 = arith.constant 0 : index
    %c0_22 = arith.constant 0 : index
    %55 = vector.load %arg5[%c0_21, %c0_22] : memref<2x256xf32, #tpu.memory_space<vmem>>, vector<2x256xf32>
    tpu.vector_store %arg5[%c0_21, %c0_22], %54 {strides = array<i32>} : memref<2x256xf32, #tpu.memory_space<vmem>>, vector<2x256xf32>,
    return
  }
  func.func @transform_0(%arg0: i32) -> (i32, i32) {
    %c0_i32 = arith.constant 0 : i32
    %c0_i32_0 = arith.constant 0 : i32
    return %arg0, %c0_i32 : i32, i32
  }
  func.func @transform_1(%arg0: i32) -> (i32, i32) {
    %c0_i32 = arith.constant 0 : i32
    %c0_i32_0 = arith.constant 0 : i32
    return %arg0, %c0_i32 : i32, i32
  }
  func.func @transform_2(%arg0: i32) -> (i32, i32) {
    %c0_i32 = arith.constant 0 : i32
    %c0_i32_0 = arith.constant 0 : i32
    %c0_i32_1 = arith.constant 0 : i32
    return %c0_i32, %c0_i32_0 : i32, i32
  }
  func.func @transform_3(%arg0: i32) -> (i32, i32) {
    %c0_i32 = arith.constant 0 : i32
    %c0_i32_0 = arith.constant 0 : i32
    %c0_i32_1 = arith.constant 0 : i32
    return %c0_i32, %c0_i32_0 : i32, i32
  }
  func.func @transform_4(%arg0: i32) -> (i32, i32) {
    %c0_i32 = arith.constant 0 : i32
    %c0_i32_0 = arith.constant 0 : i32
    return %arg0, %c0_i32 : i32, i32
  }
}

</mosaic_0001>

<bundles_post_ra>
// kernel: tpu_custom_call.1
= control target key start
LH: loop header
LB: loop body
LE: loop exit
PB: predicated region body
PF: predicated region fallthrough
CT: control target
= control target key end

     0   :  { %v969_v1 = vmov 0.0   ;;  %vm970_vm0 = vmmov 0   ;;  %s971_s23 = smov 96   ;;  %s972_s24 = smov 32   ;;  %s1219_s0 = inlined_call_operand.vmem [shape: f32[2,256], index: 0, kind: input, shape index: {}]   ;;  %s1220_s1 = inlined_call_operand.vmem [shape: bf16[2,48], index: 1, kind: input, shape index: {}]   ;;  %s1221_s2 = inlined_call_operand.vmem [shape: bf16[112,32], index: 2, kind: input, shape index: {}]   ;;  %s1222_s3 = inlined_call_operand.vmem [shape: f32[5,32], index: 3, kind: input, shape index: {}]   ;;  %s1223_s4 = inlined_call_operand.hbm [shape: f32[2,256], index: 4, kind: output, shape index: {}]  }
   0x1   :  { %v934_v0 = vld [vmem:[%s1221_s2] sm:$0xff]   ;;  %895 = vmatprep.subr.bf16.mxu0 %v969_v1  ;;  %905 = vmatprep.subr.bf16.mxu1 %v969_v1  ;;  %v935_v2 = vld [vmem:[%s1221_s2 + $0x8] sm:$0xff]   ;;  %v936_v4 = vld [vmem:[%s1221_s2 + $0x10] sm:$0xff]  }
   0x2   :  { %896 = vmatpush3.bf16.msra.mxu0 %v934_v0  ;;  %901 = vmatprep.mubr.msk.bf16.mxu0 %vm970_vm0, %v969_v1  ;;  %v19_v3 = vld [vmem:[%s1219_s0] sm:$0xf] }
   0x3   :  { %897 = vmatprep.subr.bf16.mxu0 %v969_v1  ;;  %909 = vmatprep.mubr.msk.bf16.mxu1 %vm970_vm0, %v969_v1 }
   0x4   :  { %23 = vrot.lane.b32.xlu0 %v19_v3, %s971_s23  ;;  %31 = vrot.lane.b32.xlu1 %v19_v3, %s972_s24 }
   0x6   :  { %898 = vmatpush3.bf16.msra.mxu0 %v935_v2 }
   0x7   :  { %899 = vmatprep.subr.bf16.mxu0 %v969_v1 }
   0x8   :  { %9 = vsyncpa [#allocation3], 0  ;;  %s973_s25 = smov 64   ;;  %v74_v5 = vld [vmem:[%s1220_s1] sm:$0x1]  ;;  %vm116_vm1 = vcmask 392192   ;;  %v42_v6 = vlaneseq }
   0x9   :  { %27 = vrot.lane.b32.xlu0 %v19_v3, %s973_s25  ;;  %v974_v7 = vmov 1966171168   ;;  %v975_v12 = vmov 1934713408   ;;  %v976_v14 = vmov 1983009808  }
   0xa   :  { %900 = vmatpush3.bf16.msra.mxu0 %v936_v4  ;;  %v162_v8 = vunpack.c.l.s4 %v974_v7  ;;  %v1033_v10 = vshrl.u32 %v42_v6, 7  ;;  %v40_v13 = vunpack.c.l.s4 %v975_v12  ;;  %v193_v15 = vunpack.c.l.s4 %v976_v14  ;;  %v869_v16 = vld [vmem:[%s1222_s3] ss:$0 sm:$0xff] }
   0xb   :  { %v21_v33 = vrot.slane %v19_v3, 2  ;;  %vm285_vm2 = vcmask 261120   ;;  %vm836_vm3 = vcmask 523264   ;;  %vm838_vm4 = vcmask 785408  }
   0xc   :  { %v163_v11 = vunpack.c.0.s8 %v162_v8  ;;  %v41_v21 = vunpack.c.0.s8 %v40_v13  ;;  %v194_v23 = vunpack.c.0.s8 %v193_v15  ;;  %v185_v29 = vsub.s32 0, %v1033_v10 }
   0xd   :  { %902 = vmatmul.mubr.msk.bf16.vlgmr.msra.gmra.mrb[0].mxu0 %vm116_vm1, %v74_v5 }
   0xe   :  { %v166_v17 = vsub.s32 %v163_v11, %v1033_v10  ;;  %v1041_v32 = vsub.s32 %v41_v21, %v1033_v10  ;;  %v1044_v37 = vsub.s32 %v194_v23, %v1033_v10 }
  0x76   :  { %v24_v9 = vpop.permute.xlu0 %23  ;;  %v32_v18 = vpop.permute.xlu1 %31 }
  0x77   :  { %v33_v26 = vrot.slane %v32_v18, 2  ;;  %v25_v34 = vrot.slane %v24_v9, 2  ;;  %v38_v38 = vcombine.low %v19_v3, %v24_v9 }
  0x79   :  { %v56_v43 = vcombine.low %v21_v33, %v25_v34  ;;  %v45_v47 = vrot.slane %v38_v38, %v1041_v32 }
  0x7b   :  { %v28_v19 = vpop.permute.xlu0 %27  ;;  %v63_v53 = vrot.slane %v56_v43, %v1041_v32  ;;  %v46_v55 = vcombine.high %v45_v47, %v969_v1 }
  0x7c   :  { %v29_v27 = vrot.slane %v28_v19, 2  ;;  %v47_v31 = vcombine.low %v28_v19, %v32_v18 }
  0x7d   :  { %v64_v2 = vcombine.high %v63_v53, %v969_v1 }
  0x7e   :  { %v65_v39 = vcombine.low %v29_v27, %v33_v26  ;;  %v54_v42 = vrot.slane %v47_v31, %v1041_v32  ;;  %v980_v26 = vmov 1987475062  }
  0x7f   :  { %v319_v27 = vunpack.c.l.s4 %v980_v26  ;;  %v875_v26 = vld [vmem:[%s1222_s3 + $0x2] ss:$0 sm:$0xff] }
  0x80   :  { %v72_v48 = vrot.slane %v65_v39, %v1041_v32  ;;  %v55_v52 = vcombine.high %v54_v42, %v969_v1 }
  0x81   :  { %v320_v31 = vunpack.c.0.s8 %v319_v27 }
  0x82   :  { %v73_v59 = vcombine.high %v72_v48, %v969_v1 }
  0xe0   :  { %v154_v20 = vpop.f32.mrb[0].mxu0 }
  0xe1   :  { %v155_v22 = vadd.f32 %v869_v16, %v154_v20  ;;  %v903_v24 = vpop.f32.mrb[1].mxu0  ;;  %v977_v20 = vmov 269488144  }
  0xe2   :  { %v157_v25 = vpop.f32.mrb[2].mxu0  ;;  %v298_v21 = vunpack.c.l.s4 %v977_v20  ;;  %v979_v24 = vmov 1414812756  }
  0xe3   :  { %v167_v28 = vrot.slane %v155_v22, %v166_v17  ;;  %v904_v30 = vpop.f32.mrb[3].mxu0  ;;  %v978_v22 = vmov 842150450   ;;  %v312_v25 = vunpack.c.l.s4 %v979_v24  ;;  %v874_v24 = vld [vmem:[%s1222_s3 + $0x1] ss:$0 sm:$0xff] }
  0xe4   :  { %v305_v23 = vunpack.c.l.s4 %v978_v22  ;;  %v512_v27 = vcombine.high %v874_v24, %v874_v24 }
  0xe5   :  { %v168_v35 = vcombine.high %v167_v28, %v167_v28  ;;  %v175_v36 = vrot.slane %v167_v28, %v166_v17  ;;  %v299_v28 = vunpack.c.0.s8 %v298_v21  ;;  %v313_v30 = vunpack.c.0.s8 %v312_v25 }
  0xe7   :  { %v182_v40 = vrot.slane %v168_v35, %v166_v17  ;;  %v186_v41 = vrot.slane %v175_v36, %v185_v29  ;;  %v1071_v33 = vsub.s32 %v299_v28, %v1033_v10  ;;  %v1077_v35 = vsub.s32 %v313_v30, %v1033_v10 }
  0xe8   :  { %v1080_v36 = vsub.s32 %v320_v31, %v1033_v10  ;;  %v546_v28 = vcombine.high %v875_v26, %v875_v26  ;;  %v526_v30 = vrot.slane %v512_v27, %v1044_v37  ;;  %v553_v31 = vrot.slane %v875_v26, %v1044_v37 }
  0xe9   :  { %v190_v44 = vrot.slane %v182_v40, %v185_v29  ;;  %v191_v45 = vcombine.high %v186_v41, %v186_v41  ;;  %v198_v46 = vrot.slane %v186_v41, %v1044_v37  ;;  %v306_v29 = vunpack.c.0.s8 %v305_v23 }
  0xeb   :  { %v208_v49 = vcombine.high %v190_v44, %v190_v44  ;;  %v205_v50 = vrot.slane %v191_v45, %v1044_v37  ;;  %v215_v51 = vrot.slane %v190_v44, %v1044_v37  ;;  %v206_v54 = vcombine.high %v198_v46, %v198_v46 }
  0xec   :  { %v233_v58 = vadd.f32 %v198_v46, %v45_v47  ;;  %v1074_v34 = vsub.s32 %v306_v29, %v1033_v10  ;;  %v519_v29 = vrot.slane %v874_v24, %v1044_v37  ;;  %v940_v24 = vld [vmem:[%s1221_s2 + $0x30] sm:$0xff]  }
  0xed   :  { %v207_v56 = vcombine.high %v205_v50, %v205_v50  ;;  %v223_v57 = vcombine.high %v215_v51, %v215_v51  ;;  %v234_v60 = vadd.f32 %v206_v54, %v54_v42  ;;  %v222_v61 = vrot.slane %v208_v49, %v1044_v37 }
  0xee   :  { %v235_v62 = vadd.f32 %v205_v50, %v63_v53  ;;  %v237_v3 = vadd.f32 %v215_v51, %v46_v55 }
  0xef   :  { %v236_v63 = vadd.f32 %v207_v56, %v72_v48  ;;  %v238_v0 = vadd.f32 %v223_v57, %v55_v52  ;;  %v249_v4 = vcombine.low %v233_v58, %v234_v60  ;;  %v224_v5 = vcombine.high %v222_v61, %v222_v61 }
  0xf0   :  { %v239_v7 = vadd.f32 %v222_v61, %v64_v2 }
  0xf1   :  { %v250_v6 = vcombine.low %v235_v62, %v236_v63  ;;  %v240_v8 = vadd.f32 %v224_v5, %v73_v59  ;;  %v266_v9 = vcombine.low %v237_v3, %v238_v0  ;;  %v257_v11 = vrot.slane %v249_v4, %v1044_v37 }
  0xf3   :  { %v264_v12 = vrot.slane %v250_v6, %v1044_v37  ;;  %v267_v13 = vcombine.low %v239_v7, %v240_v8  ;;  %v274_v15 = vrot.slane %v266_v9, %v1044_v37 }
  0xf5   :  { %v1060_v14 = vcombine.low %v257_v11, %v264_v12  ;;  %v281_v16 = vrot.slane %v267_v13, %v1044_v37 }
  0xf7   :  { %v286_v17 = vsel %vm285_vm2, %v1060_v14, 0.0  ;;  %v1066_v18 = vcombine.low %v274_v15, %v281_v16  ;;  %v937_v16 = vld [vmem:[%s1221_s2 + $0x18] sm:$0xff]  }
  0xf8   :  { %287 = vadd.xlane.f32.xlu1 %v286_v17  ;;  %906 = vmatpush3.bf16.msra.mxu1 %v937_v16  ;;  %v938_v17 = vld [vmem:[%s1221_s2 + $0x20] sm:$0xff]  }
  0xf9   :  { %v289_v19 = vsel %vm285_vm2, %v1066_v18, 0.0  ;;  %907 = vmatprep.subr.bf16.mxu1 %v969_v1 }
  0xfa   :  { %290 = vadd.xlane.f32.xlu0 %v289_v19 }
  0xfc   :  { %908 = vmatpush3.bf16.msra.mxu1 %v938_v17 }
  0xfd   :  { %913 = vmatprep.subr.bf16.mxu1 %v969_v1 }
 0x185   :  { %v288_v38 = vpop.xlane.xlu1 %287 }
 0x186   :  { %v293_v39 = vmul.f32 0.03125, %v288_v38  ;;  %v560_v38 = vrot.slane %v546_v28, %v1044_v37 }
 0x187   :  { %v291_v44 = vpop.xlane.xlu0 %290 }
 0x188   :  { %v303_v40 = vrot.slane %v293_v39, %v1071_v33  ;;  %v310_v41 = vrot.slane %v293_v39, %v1074_v34  ;;  %v317_v42 = vrot.slane %v293_v39, %v1077_v35  ;;  %v324_v43 = vrot.slane %v293_v39, %v1080_v36 }
 0x189   :  { %v294_v45 = vmul.f32 0.03125, %v291_v44 }
 0x18a   :  { %v1086_v46 = vsub.f32 %v233_v58, %v303_v40  ;;  %v1088_v47 = vsub.f32 %v234_v60, %v310_v41  ;;  %v1090_v48 = vsub.f32 %v235_v62, %v317_v42  ;;  %v1092_v10 = vsub.f32 %v236_v63, %v324_v43 }
 0x18b   :  { %v331_v49 = vrot.slane %v294_v45, %v1071_v33  ;;  %v338_v50 = vrot.slane %v294_v45, %v1074_v34  ;;  %v345_v51 = vrot.slane %v294_v45, %v1077_v35  ;;  %v352_v52 = vrot.slane %v294_v45, %v1080_v36 }
 0x18c   :  { %v369_v53 = vmul.f32 %v1086_v46, %v1086_v46  ;;  %v370_v54 = vmul.f32 %v1088_v47, %v1088_v47  ;;  %v371_v55 = vmul.f32 %v1090_v48, %v1090_v48  ;;  %v372_v56 = vmul.f32 %v1092_v10, %v1092_v10 }
 0x18d   :  { %v1106_v57 = vsub.f32 %v237_v3, %v331_v49  ;;  %v1108_v58 = vsub.f32 %v238_v0, %v338_v50  ;;  %v1110_v59 = vsub.f32 %v239_v7, %v345_v51  ;;  %v1112_v60 = vsub.f32 %v240_v8, %v352_v52 }
 0x18e   :  { %v385_v61 = vcombine.low %v369_v53, %v370_v54  ;;  %v386_v62 = vcombine.low %v371_v55, %v372_v56  ;;  %v527_v40 = vcombine.high %v519_v29, %v519_v29  ;;  %v528_v41 = vcombine.high %v526_v30, %v526_v30 }
 0x18f   :  { %v373_v63 = vmul.f32 %v1106_v57, %v1106_v57  ;;  %v374_v2 = vmul.f32 %v1108_v58, %v1108_v58  ;;  %v375_v4 = vmul.f32 %v1110_v59, %v1110_v59  ;;  %v376_v3 = vmul.f32 %v1112_v60, %v1112_v60 }
 0x190   :  { %v393_v0 = vrot.slane %v385_v61, %v1044_v37  ;;  %v400_v5 = vrot.slane %v386_v62, %v1044_v37  ;;  %v561_v49 = vcombine.high %v553_v31, %v553_v31  ;;  %v562_v50 = vcombine.high %v560_v38, %v560_v38 }
 0x191   :  { %v402_v6 = vcombine.low %v373_v63, %v374_v2  ;;  %v403_v7 = vcombine.low %v375_v4, %v376_v3 }
 0x192   :  { %v401_v8 = vcombine.low %v393_v0, %v400_v5 }
 0x193   :  { %v410_v9 = vrot.slane %v402_v6, %v1044_v37  ;;  %v417_v11 = vrot.slane %v403_v7, %v1044_v37 }
 0x194   :  { %v421_v12 = vsel %vm285_vm2, %v401_v8, 0.0 }
 0x195   :  { %422 = vadd.xlane.f32.xlu0 %v421_v12  ;;  %v418_v13 = vcombine.low %v410_v9, %v417_v11 }
 0x197   :  { %v424_v15 = vsel %vm285_vm2, %v418_v13, 0.0 }
 0x198   :  { %425 = vadd.xlane.f32.xlu1 %v424_v15 }
 0x222   :  { %v423_v19 = vpop.xlane.xlu0 %422 }
 0x223   :  { %v427_v20 = vmul.f32 0.03125, %v423_v19 }
 0x225   :  { %v429_v21 = vadd.f32 1e-05, %v427_v20  ;;  %v426_v22 = vpop.xlane.xlu1 %425 }
 0x226   :  { %v428_v23 = vmul.f32 0.03125, %v426_v22 }
 0x227   :  { %941 = vrsqrt.f32 %v429_v21 }
 0x228   :  { %v430_v25 = vadd.f32 1e-05, %v428_v23  ;;  %v939_v23 = vld [vmem:[%s1221_s2 + $0x28] sm:$0xff]   ;;  %s981_s2 = smov [#allocation2]  }
 0x22a   :  { %943 = vrsqrt.f32 %v430_v25  ;;  %v876_v25 = vld [vmem:[%s1222_s3 + $0x3] ss:$0 sm:$0xff] }
 0x231   :  { %v942_v39 = vpop.eup %941 }
 0x232   :  { %v441_v42 = vrot.slane %v942_v39, %v1071_v33  ;;  %v448_v43 = vrot.slane %v942_v39, %v1074_v34  ;;  %v455_v44 = vrot.slane %v942_v39, %v1077_v35  ;;  %v462_v45 = vrot.slane %v942_v39, %v1080_v36 }
 0x234   :  { %v944_v51 = vpop.eup %943  ;;  %v499_v52 = vmul.f32 %v441_v42, %v1086_v46  ;;  %v500_v53 = vmul.f32 %v448_v43, %v1088_v47  ;;  %v501_v54 = vmul.f32 %v455_v44, %v1090_v48  ;;  %v502_v55 = vmul.f32 %v462_v45, %v1092_v10 }
 0x235   :  { %v469_v56 = vrot.slane %v944_v51, %v1071_v33  ;;  %v476_v61 = vrot.slane %v944_v51, %v1074_v34  ;;  %v483_v62 = vrot.slane %v944_v51, %v1077_v35  ;;  %v490_v63 = vrot.slane %v944_v51, %v1080_v36 }
 0x236   :  { %v533_v2 = vmul.f32 %v519_v29, %v499_v52  ;;  %v534_v4 = vmul.f32 %v527_v40, %v500_v53  ;;  %v535_v3 = vmul.f32 %v526_v30, %v501_v54  ;;  %v536_v0 = vmul.f32 %v528_v41, %v502_v55 }
 0x237   :  { %v503_v46 = vmul.f32 %v469_v56, %v1106_v57  ;;  %v504_v47 = vmul.f32 %v476_v61, %v1108_v58  ;;  %v505_v48 = vmul.f32 %v483_v62, %v1110_v59  ;;  %v506_v10 = vmul.f32 %v490_v63, %v1112_v60 }
 0x238   :  { %v567_v5 = vadd.f32 %v553_v31, %v533_v2  ;;  %v568_v33 = vadd.f32 %v561_v49, %v534_v4  ;;  %v569_v6 = vadd.f32 %v560_v38, %v535_v3  ;;  %v570_v34 = vadd.f32 %v562_v50, %v536_v0 }
 0x239   :  { %v537_v7 = vmul.f32 %v519_v29, %v503_v46  ;;  %v538_v35 = vmul.f32 %v527_v40, %v504_v47  ;;  %v539_v8 = vmul.f32 %v526_v30, %v505_v48  ;;  %v540_v36 = vmul.f32 %v528_v41, %v506_v10  ;;  %v880_v41 = vld [vmem:[%s1222_s3 + $0x4] ss:$0 sm:$0xff]  ;;  %s861_s3 = sshll.u32 %s981_s2, 4  ;;  %s862_s3 = int_to_ptr.vmem [resolvable:$true] %s861_s3 }
 0x23a   :  { %v583_v9 = vcombine.low %v567_v5, %v568_v33  ;;  %v584_v11 = vcombine.low %v569_v6, %v570_v34  ;;  %s945_s18 = scalar_lea.vmem %s862_s3, 64  ;;  %p950_p1 = scmp.lt.s32.totalorder %s862_s3, %s862_s3 }
 0x23b   :  { %v571_v12 = vadd.f32 %v553_v31, %v537_v7  ;;  %v572_v13 = vadd.f32 %v561_v49, %v538_v35  ;;  %v573_v15 = vadd.f32 %v560_v38, %v539_v8  ;;  %v574_v57 = vadd.f32 %v562_v50, %v540_v36  ;;  %p946_p0 = scmp.ne.s32.totalorder %s862_s3, %s945_s18  ;;  %p951_p2 = scmp.lt.s32.totalorder %s945_s18, %s945_s18 }
 0x23c   :  { %v591_v58 = vrot.slane %v583_v9, %v1044_v37  ;;  %v598_v59 = vrot.slane %v584_v11, %v1044_v37 }
 0x23d   :  { %v600_v16 = vcombine.low %v571_v12, %v572_v13  ;;  %v601_v60 = vcombine.low %v573_v15, %v574_v57  ;;  %p952_p3 = por %p951_p2, %p950_p1 }
 0x23e   :  { %v599_v20 = vcombine.low %v591_v58, %v598_v59 }
 0x23f   :  { %v608_v17 = vrot.slane %v600_v16, %v1044_v37  ;;  %v615_v19 = vrot.slane %v601_v60, %v1044_v37  ;;  %p953_p4 = pnand %p952_p3, %p946_p0 }
 0x241   :  { %v616_v21 = vcombine.low %v608_v17, %v615_v19 }
 0x243   :  { %v619_v22 = vpack.c.bf16 %v616_v21, %v599_v20 }
 0x245   :  { %910 = vmatmul.mubr.msk.bf16.vlgmr.msra.gmra.mrb[0].mxu1 %vm285_vm2, %v619_v22 }
 0x246   :  { %917 = vmatprep.mubr.msk.bf16.mxu1 %vm970_vm0, %v969_v1  ;;  %914 = vmatpush3.bf16.msra.mxu1 %v939_v23 }
 0x247   :  { %915 = vmatprep.subr.bf16.mxu1 %v969_v1 }
 0x24a   :  { %916 = vmatpush3.bf16.msra.mxu1 %v940_v24 }
 0x318   :  { %v673_v26 = vpop.f32.mrb[0].mxu1 }
 0x319   :  { %v674_v27 = vadd.f32 %v876_v25, %v673_v26  ;;  %v911_v28 = vpop.f32.mrb[1].mxu1 }
 0x31a   :  { %v676_v29 = vpop.f32.mrb[2].mxu1 }
 0x31b   :  { %v677_v30 = vadd.f32 %v876_v25, %v676_v29  ;;  %v912_v31 = vpop.f32.mrb[3].mxu1  ;;  %v680_v38 = vmax.f32 %v674_v27, 0.0 }
 0x31d   :  { %v681_v39 = vmax.f32 %v677_v30, 0.0 }
 0x31f   :  { %v682_v40 = vpack.c.bf16 %v681_v39, %v680_v38 }
 0x321   :  { %918 = vmatmul.mubr.msk.bf16.vlgmr.msra.gmra.mrb[4].mxu1 %vm285_vm2, %v682_v40 }
 0x3f4   :  { %v736_v42 = vpop.f32.mrb[4].mxu1 }
 0x3f5   :  { %v737_v43 = vadd.f32 %v880_v41, %v736_v42  ;;  %v919_v44 = vpop.f32.mrb[5].mxu1 }
 0x3f6   :  { %v739_v45 = vpop.f32.mrb[6].mxu1 }
 0x3f7   :  { %v743_v49 = vadd.f32 %v737_v43, %v1060_v14  ;;  %v740_v50 = vadd.f32 %v880_v41, %v739_v45  ;;  %v920_v51 = vpop.f32.mrb[7].mxu1 }
 0x3f9   :  { %v745_v52 = vcombine.high %v743_v49, %v969_v1  ;;  %v744_v53 = vadd.f32 %v740_v50, %v1066_v18  ;;  %v752_v54 = vrot.slane %v743_v49, %v1044_v37 }
 0x3fb   :  { %v760_v55 = vcombine.high %v744_v53, %v969_v1  ;;  %v767_v56 = vrot.slane %v744_v53, %v1044_v37  ;;  %v759_v61 = vrot.slane %v745_v52, %v1044_v37 }
 0x3fd   :  { %v774_v62 = vrot.slane %v760_v55, %v1044_v37  ;;  %v775_v63 = vcombine.low %v752_v54, %v767_v56  ;;  %v776_v2 = vcombine.high %v752_v54, %v767_v56 }
 0x3ff   :  { %v790_v14 = vrot.slane %v776_v2, %v1041_v32  ;;  %v783_v4 = vrot.slane %v775_v63, %v1041_v32  ;;  %v791_v3 = vcombine.low %v759_v61, %v774_v62  ;;  %v792_v0 = vcombine.high %v759_v61, %v774_v62 }
 0x401   :  { %816 = vrot.lane.b32.xlu1 %v790_v14, %s973_s25  ;;  %v807_v18 = vcombine.high %v783_v4, %v969_v1  ;;  %v799_v46 = vrot.slane %v791_v3, %v1041_v32  ;;  %v806_v37 = vrot.slane %v792_v0, %v1041_v32  ;;  %v808_v48 = vcombine.high %v790_v14, %v969_v1 }
 0x403   :  { %812 = vrot.lane.b32.xlu0 %v807_v18, %s972_s24  ;;  %v809_v47 = vcombine.high %v799_v46, %v969_v1  ;;  %v810_v10 = vcombine.high %v806_v37, %v969_v1 }
 0x405   :  { %824 = vrot.lane.b32.xlu1 %v809_v47, %s972_s24 }
 0x407   :  { %828 = vrot.lane.b32.xlu0 %v806_v37, %s973_s25 }
 0x409   :  { %820 = vrot.lane.b32.xlu1 %v808_v48, %s971_s23 }
 0x40b   :  { %832 = vrot.lane.b32.xlu0 %v810_v10, %s971_s23 }
 0x473   :  { %v817_v5 = vpop.permute.xlu1 %816 }
 0x475   :  { %v813_v33 = vpop.permute.xlu0 %812 }
 0x476   :  { %v835_v7 = vsel %vm285_vm2, %v783_v4, %v813_v33 }
 0x477   :  { %v825_v6 = vpop.permute.xlu1 %824  ;;  %v837_v36 = vsel %vm836_vm3, %v835_v7, %v817_v5 }
 0x478   :  { %v840_v35 = vsel %vm285_vm2, %v799_v46, %v825_v6 }
 0x479   :  { %v829_v34 = vpop.permute.xlu0 %828 }
 0x47a   :  { %v841_v8 = vsel %vm836_vm3, %v840_v35, %v829_v34 }
 0x47b   :  { %v821_v32 = vpop.permute.xlu1 %820 }
 0x47c   :  { %v839_v11 = vsel %vm838_vm4, %v837_v36, %v821_v32 }
 0x47d   :  { %v833_v9 = vpop.permute.xlu0 %832 }
 0x47e   :  { %v842_v1 = vsel %vm838_vm4, %v841_v8, %v833_v9 }
 0x47f   :  { %v845_v12 = vcombine.low %v839_v11, %v842_v1 }
 0x481   :  { %884 = vst.sshfl [vmem:[#allocation2] sm:$0x33 pattern:$0x76325410] %v845_v12 }
 0x482   :  { %956 = shalt.err (!%p953_p4)
}
 0x483   :  { %s957_s21 = scalar_lea.hbm %s1223_s4, 64 }
 0x484   :  { %p958_p5 = scmp.ne.s32.totalorder %s1223_s4, %s957_s21  ;;  %p961_p6 = scmp.lt.u32.totalorder %s957_s21, %s1223_s4 }
 0x486   :  { %p963_p7 = pnand %p961_p6, %p958_p5 }
 0x488   :  { %966 = shalt.err (!%p963_p7)
}
 0x489   :  { %864 = dma.vmem_to_hbm [thread:$0]  %s862_s3, 64, %s1223_s4, [#allocation3]  }
 0x48a   :  { %967 = dma.done.wait [#allocation3], 64  }
 0x48b   :  { %968 = vsyncadd [#allocation3], 4294967232 }
 0x48c   :  { %868 = vsyncpa [#allocation3], 1 }

</bundles_post_ra>
